<compile_context>
chip_gen: v6e
topology: v6e:2x2x1
jax: 0.10.0
libtpu: 0.0.40
codegen_flags: <defaults>
</compile_context>

<pallas_src>
import functools

import jax
import jax.numpy as jnp
from jax.experimental import pallas as pl
from jax.experimental.pallas import tpu as pltpu

EPS = 1e-5  # nn.LayerNorm default


def _prenorm_kernel(x_ref, gamma_ref, beta_ref, w_ref, b_ref, o_ref):
    # x_ref:     (tm, D)   row tile of flattened (B*N, D)
    # gamma_ref: (1, D)
    # beta_ref:  (1, D)
    # w_ref:     (D, tn)   fn = Linear(D, H) weight tile (D x H layout)
    # b_ref:     (1, tn)
    # o_ref:     (tm, tn)
    x = x_ref[...].astype(jnp.float32)

    # LayerNorm over last axis in f32 (biased variance, matching torch).
    mean = jnp.mean(x, axis=-1, keepdims=True)
    xc = x - mean
    var = jnp.mean(xc * xc, axis=-1, keepdims=True)
    inv = jax.lax.rsqrt(var + EPS)
    y = xc * inv * gamma_ref[...].astype(jnp.float32) \
        + beta_ref[...].astype(jnp.float32)

    # fn (Linear) on the MXU: keep the matmul in the weight's dtype
    # (bf16 for real models), accumulate in f32.
    y = y.astype(w_ref.dtype)
    out = jnp.dot(y, w_ref[...], preferred_element_type=jnp.float32)
    out = out + b_ref[...].astype(jnp.float32)
    o_ref[...] = out.astype(o_ref.dtype)


def _round_up(a, m):
    return (a + m - 1) // m * m


@functools.partial(jax.jit, static_argnames=("block_rows", "block_cols"))
def prenorm(x, gamma, beta, w, b, *, block_rows=256, block_cols=512):
    """PreNorm(dim, fn=Linear(dim, hidden)) forward: fn(LayerNorm(x))."""
    B, N, D = x.shape
    H = w.shape[1]
    rows = B * N

    # Row tile: multiple of 8 (sublane), at most block_rows.
    tm = min(block_rows, _round_up(rows, 8))
    rows_p = _round_up(rows, tm)

    # Column tile over H: largest multiple of 128 <= block_cols that divides H;
    # fall back to the full extent when H is not a multiple of 128.
    if H % 128 == 0:
        tn = min(block_cols, H)
        while H % tn != 0:
            tn -= 128
    else:
        tn = H  # full-extent block is always legal (masked stores on small H)

    x2 = x.reshape(rows, D)
    if rows_p != rows:
        # Padded rows normalize to beta and are sliced off after the call.
        x2 = jnp.pad(x2, ((0, rows_p - rows), (0, 0)))

    gamma2 = gamma.reshape(1, D)
    beta2 = beta.reshape(1, D)
    b2 = b.reshape(1, H)

    out2 = pl.pallas_call(
        _prenorm_kernel,
        out_shape=jax.ShapeDtypeStruct((rows_p, H), x.dtype),
        grid_spec=pltpu.PrefetchScalarGridSpec(
            num_scalar_prefetch=0,
            grid=(rows_p // tm, H // tn),
            in_specs=[
                pl.BlockSpec((tm, D), lambda i, j: (i, 0)),
                pl.BlockSpec((1, D), lambda i, j: (0, 0)),
                pl.BlockSpec((1, D), lambda i, j: (0, 0)),
                pl.BlockSpec((D, tn), lambda i, j: (0, j)),
                pl.BlockSpec((1, tn), lambda i, j: (0, j)),
            ],
            out_specs=pl.BlockSpec((tm, tn), lambda i, j: (i, j)),
        ),
        compiler_params=pltpu.CompilerParams(
            dimension_semantics=("parallel", "parallel"),
            vmem_limit_bytes=64 * 1024 * 1024,
        ),
    )(x2, gamma2, beta2, w, b2)

    if rows_p != rows:
        out2 = out2[:rows]
    return out2.reshape(B, N, H)


def _reference(x, gamma, beta, w, b):
    xf = x.astype(jnp.float32)
    mean = xf.mean(-1, keepdims=True)
    var = ((xf - mean) ** 2).mean(-1, keepdims=True)
    y = (xf - mean) / jnp.sqrt(var + EPS) * gamma.astype(jnp.float32) \
        + beta.astype(jnp.float32)
    out = y @ w.astype(jnp.float32) + b.astype(jnp.float32)
    return out.astype(x.dtype)


if __name__ == "__main__":
    key = jax.random.PRNGKey(0)
    # Small but representative: non-multiple-of-8 token count exercises the
    # padded-tail path; D/H multiples of 128 keep stores lane-dense.
    B, N, D, H = 2, 13, 128, 256

    kx, kg, kb, kw, kbias = jax.random.split(key, 5)
    x = jax.random.normal(kx, (B, N, D), dtype=jnp.float32)
    gamma = 1.0 + 0.01 * jax.random.normal(kg, (D,), dtype=jnp.float32)
    beta = 0.01 * jax.random.normal(kb, (D,), dtype=jnp.float32)
    w = jax.random.normal(kw, (D, H), dtype=jnp.float32) * (D ** -0.5)
    b = 0.01 * jax.random.normal(kbias, (H,), dtype=jnp.float32)

    # f32 path (exact check vs f32 reference).
    out = prenorm(x, gamma, beta, w, b)
    jax.block_until_ready(out)
    ref = _reference(x, gamma, beta, w, b)
    assert out.shape == (B, N, H)
    assert jnp.allclose(out, ref, atol=1e-4, rtol=1e-4), "f32 mismatch vs reference"

    # bf16 mixed-precision path (f32 stats, bf16 matmul) -- looser tolerance.
    xb = x.astype(jnp.bfloat16)
    wb = w.astype(jnp.bfloat16)
    bb = b.astype(jnp.bfloat16)
    out_b = prenorm(xb, gamma, beta, wb, bb)
    jax.block_until_ready(out_b)
    ref_b = _reference(xb, gamma, beta, wb, bb)
    assert out_b.shape == (B, N, H)
    assert jnp.allclose(out_b.astype(jnp.float32), ref_b.astype(jnp.float32),
                        atol=5e-2, rtol=5e-2), "bf16 mismatch vs reference"

    print("KERNEL_OK")
</pallas_src>

<mosaic_0001>
module attributes {stable_mosaic.version = 11 : i64} {
  func.func @_prenorm_kernel(%arg0: i32, %arg1: i32, %arg2: memref<32x128xf32, #tpu.memory_space<vmem>>, %arg3: memref<1x128xf32, #tpu.memory_space<vmem>>, %arg4: memref<1x128xf32, #tpu.memory_space<vmem>>, %arg5: memref<128x256xf32, #tpu.memory_space<vmem>>, %arg6: memref<1x256xf32, #tpu.memory_space<vmem>>, %arg7: memref<32x256xf32, #tpu.memory_space<vmem>>) attributes {dimension_semantics = [#tpu.dimension_semantics<parallel>, #tpu.dimension_semantics<parallel>], iteration_bounds = array<i64: 1, 1>, scalar_prefetch = 0 : i64, scratch_operands = 0 : i64, tpu.core_type = #tpu.core_type<tc>, window_params = [{transform_indices = @transform_0, window_bounds = array<i64: 32, 128>}, {pipeline_mode = #tpu.pipeline_mode<synchronous>, transform_indices = @transform_1, window_bounds = array<i64: 1, 128>}, {pipeline_mode = #tpu.pipeline_mode<synchronous>, transform_indices = @transform_2, window_bounds = array<i64: 1, 128>}, {transform_indices = @transform_3, window_bounds = array<i64: 128, 256>}, {transform_indices = @transform_4, window_bounds = array<i64: 1, 256>}, {transform_indices = @transform_5, window_bounds = array<i64: 32, 256>}]} {
    %c0 = arith.constant 0 : index
    %c0_0 = arith.constant 0 : index
    %0 = vector.load %arg2[%c0, %c0_0] : memref<32x128xf32, #tpu.memory_space<vmem>>, vector<32x128xf32>
    %cst = arith.constant dense<0.000000e+00> : vector<32xf32>
    %1 = vector.multi_reduction <add>, %0, %cst [1] : vector<32x128xf32> to vector<32xf32>
    %2 = vector.shape_cast %1 : vector<32xf32> to vector<32x1xf32>
    %cst_1 = arith.constant 1.280000e+02 : f32
    %3 = vector.broadcast %cst_1 : f32 to vector<32x1xf32>
    %4 = arith.divf %2, %3 : vector<32x1xf32>
    %5 = vector.broadcast %4 : vector<32x1xf32> to vector<32x128xf32>
    %6 = arith.subf %0, %5 : vector<32x128xf32>
    %7 = arith.mulf %6, %6 : vector<32x128xf32>
    %cst_2 = arith.constant dense<0.000000e+00> : vector<32xf32>
    %8 = vector.multi_reduction <add>, %7, %cst_2 [1] : vector<32x128xf32> to vector<32xf32>
    %9 = vector.shape_cast %8 : vector<32xf32> to vector<32x1xf32>
    %cst_3 = arith.constant 1.280000e+02 : f32
    %10 = vector.broadcast %cst_3 : f32 to vector<32x1xf32>
    %11 = arith.divf %9, %10 : vector<32x1xf32>
    %cst_4 = arith.constant 9.99999974E-6 : f32
    %12 = vector.broadcast %cst_4 : f32 to vector<32x1xf32>
    %13 = arith.addf %11, %12 : vector<32x1xf32>
    %14 = math.rsqrt %13 : vector<32x1xf32>
    %15 = vector.broadcast %14 : vector<32x1xf32> to vector<32x128xf32>
    %16 = arith.mulf %6, %15 : vector<32x128xf32>
    %c0_5 = arith.constant 0 : index
    %c0_6 = arith.constant 0 : index
    %17 = vector.load %arg3[%c0_5, %c0_6] : memref<1x128xf32, #tpu.memory_space<vmem>>, vector<1x128xf32>
    %18 = vector.broadcast %17 : vector<1x128xf32> to vector<32x128xf32>
    %19 = arith.mulf %16, %18 : vector<32x128xf32>
    %c0_7 = arith.constant 0 : index
    %c0_8 = arith.constant 0 : index
    %20 = vector.load %arg4[%c0_7, %c0_8] : memref<1x128xf32, #tpu.memory_space<vmem>>, vector<1x128xf32>
    %21 = vector.broadcast %20 : vector<1x128xf32> to vector<32x128xf32>
    %22 = arith.addf %19, %21 : vector<32x128xf32>
    %c0_9 = arith.constant 0 : index
    %c0_10 = arith.constant 0 : index
    %23 = vector.load %arg5[%c0_9, %c0_10] : memref<128x256xf32, #tpu.memory_space<vmem>>, vector<128x256xf32>
    %cst_11 = arith.constant dense<0.000000e+00> : vector<32x256xf32>
    %24 = tpu.matmul %22, %23, %cst_11 {dimension_numbers = #tpu.dot_dimension_numbers<[1], [0], [0], [1], [0, 0, 1, 1], [], []>} : vector<32x128xf32>, vector<128x256xf32>, vector<32x256xf32> -> vector<32x256xf32>
    %c0_12 = arith.constant 0 : index
    %c0_13 = arith.constant 0 : index
    %25 = vector.load %arg6[%c0_12, %c0_13] : memref<1x256xf32, #tpu.memory_space<vmem>>, vector<1x256xf32>
    %26 = vector.broadcast %25 : vector<1x256xf32> to vector<32x256xf32>
    %27 = arith.addf %24, %26 : vector<32x256xf32>
    %c0_14 = arith.constant 0 : index
    %c0_15 = arith.constant 0 : index
    %28 = vector.load %arg7[%c0_14, %c0_15] : memref<32x256xf32, #tpu.memory_space<vmem>>, vector<32x256xf32>
    tpu.vector_store %arg7[%c0_14, %c0_15], %27 {strides = array<i32>} : memref<32x256xf32, #tpu.memory_space<vmem>>, vector<32x256xf32>,
    return
  }
  func.func @transform_0(%arg0: i32, %arg1: i32) -> (i32, i32) {
    %c0_i32 = arith.constant 0 : i32
    %c0_i32_0 = arith.constant 0 : i32
    return %arg0, %c0_i32 : i32, i32
  }
  func.func @transform_1(%arg0: i32, %arg1: i32) -> (i32, i32) {
    %c0_i32 = arith.constant 0 : i32
    %c0_i32_0 = arith.constant 0 : i32
    %c0_i32_1 = arith.constant 0 : i32
    return %c0_i32, %c0_i32_0 : i32, i32
  }
  func.func @transform_2(%arg0: i32, %arg1: i32) -> (i32, i32) {
    %c0_i32 = arith.constant 0 : i32
    %c0_i32_0 = arith.constant 0 : i32
    %c0_i32_1 = arith.constant 0 : i32
    return %c0_i32, %c0_i32_0 : i32, i32
  }
  func.func @transform_3(%arg0: i32, %arg1: i32) -> (i32, i32) {
    %c0_i32 = arith.constant 0 : i32
    %c0_i32_0 = arith.constant 0 : i32
    return %c0_i32, %arg1 : i32, i32
  }
  func.func @transform_4(%arg0: i32, %arg1: i32) -> (i32, i32) {
    %c0_i32 = arith.constant 0 : i32
    %c0_i32_0 = arith.constant 0 : i32
    return %c0_i32, %arg1 : i32, i32
  }
  func.func @transform_5(%arg0: i32, %arg1: i32) -> (i32, i32) {
    %c0_i32 = arith.constant 0 : i32
    return %arg0, %arg1 : i32, i32
  }
}

</mosaic_0001>

<bundles_post_ra>
// kernel: prenorm.1
= control target key start
LH: loop header
LB: loop body
LE: loop exit
PB: predicated region body
PF: predicated region fallthrough
CT: control target
= control target key end

     0   :  { %10 = vsyncpa [#allocation3], 0  ;;  %s319_s18 = smov [#allocation2]   ;;  %s421_s0 = inlined_call_operand.vmem [shape: f32[32,128], index: 0, kind: input, shape index: {}]   ;;  %s422_s1 = inlined_call_operand.vmem [shape: f32[1,128], index: 1, kind: input, shape index: {}]   ;;  %s423_s2 = inlined_call_operand.vmem [shape: f32[1,128], index: 2, kind: input, shape index: {}]   ;;  %s424_s3 = inlined_call_operand.hbm [shape: f32[128,256], index: 3, kind: input, shape index: {}]   ;;  %s425_s4 = inlined_call_operand.vmem [shape: f32[1,256], index: 4, kind: input, shape index: {}]   ;;  %s426_s5 = inlined_call_operand.vmem [shape: f32[32,256], index: 5, kind: output, shape index: {}]  }
   0x1   :  { %s22_s19 = sshll.u32 %s319_s18, 4  ;;  %s23_s19 = int_to_ptr.vmem [resolvable:$true] %s22_s19 }
   0x2   :  { %s305_s20 = scalar_lea.vmem %s23_s19, 4096  ;;  %p310_p1 = scmp.lt.s32.totalorder %s23_s19, %s23_s19 }
   0x3   :  { %p306_p0 = scmp.ne.s32.totalorder %s23_s19, %s305_s20  ;;  %p311_p2 = scmp.lt.s32.totalorder %s305_s20, %s305_s20 }
   0x5   :  { %p312_p3 = por %p311_p2, %p310_p1 }
   0x7   :  { %p313_p4 = pnand %p312_p3, %p306_p0 }
   0x9   :  { %316 = shalt.err (!%p313_p4)
}
   0xa   :  { %s320_s21 = smov 256   ;;  %s321_s22 = smov 16  }
   0xb   :  { %28 = dma.hbm_to_vmem [thread:$0]  %s424_s3, 4096, %s23_s19, [#allocation3], %s320_s21, %s320_s21, %s321_s22  }
   0xc   :  { %317 = dma.done.wait [#allocation3], 4096  }
   0xd   :  { %318 = vsyncadd [#allocation3], 4294963200  ;;  %v34_v0 = vld [vmem:[%s421_s0] sm:$0xff]  ;;  %v35_v1 = vld [vmem:[%s421_s0 + $0x8] sm:$0xff]  ;;  %v322_v52 = vmov 0.0  }
   0xe   :  { %38 = vadd.xlane.f32.xlu0 %v34_v0  ;;  %40 = vadd.xlane.f32.xlu1 %v35_v1  ;;  %v36_v2 = vld [vmem:[%s421_s0 + $0x10] sm:$0xff]  ;;  %v37_v3 = vld [vmem:[%s421_s0 + $0x18] sm:$0xff]  ;;  %v134_v6 = vld [vmem:[#allocation2 + $0xe8] sm:$0xff] }
   0xf   :  { %v136_v4 = vld [vmem:[#allocation2 + $0xf8] sm:$0xff]  ;;  %v135_v5 = vld [vmem:[#allocation2 + $0xf0] sm:$0xff]  ;;  %v133_v7 = vld [vmem:[#allocation2 + $0xe0] sm:$0xff]  ;;  %213 = vmatprep.mubr.f32.mxu0 %v322_v52  ;;  %225 = vmatprep.mubr.f32.mxu1 %v322_v52 }
  0x10   :  { %149 = vmatprep.subr.mxu0 %v136_v4  ;;  %253 = vmatprep.subr.mxu1 %v136_v4  ;;  %v132_v8 = vld [vmem:[#allocation2 + $0xd8] sm:$0xff]  ;;  %v131_v9 = vld [vmem:[#allocation2 + $0xd0] sm:$0xff]  ;;  %v130_v10 = vld [vmem:[#allocation2 + $0xc8] sm:$0xff] }
  0x11   :  { %150 = vmatpush1.msra.mxu0 %v135_v5  ;;  %269 = vmatpush1.msra.mxu1 %v135_v5  ;;  %v129_v11 = vld [vmem:[#allocation2 + $0xc0] sm:$0xff]  ;;  %v128_v28 = vld [vmem:[#allocation2 + $0xb8] sm:$0xff]  ;;  %v127_v29 = vld [vmem:[#allocation2 + $0xb0] sm:$0xff] }
  0x12   :  { %42 = vadd.xlane.f32.xlu0 %v36_v2  ;;  %44 = vadd.xlane.f32.xlu1 %v37_v3  ;;  %v126_v30 = vld [vmem:[#allocation2 + $0xa8] sm:$0xff]  ;;  %v125_v31 = vld [vmem:[#allocation2 + $0xa0] sm:$0xff]  ;;  %v124_v32 = vld [vmem:[#allocation2 + $0x98] sm:$0xff] }
  0x13   :  { %151 = vmatprep.subr.mxu0 %v134_v6  ;;  %254 = vmatprep.subr.mxu1 %v134_v6  ;;  %v123_v33 = vld [vmem:[#allocation2 + $0x90] sm:$0xff]  ;;  %v122_v34 = vld [vmem:[#allocation2 + $0x88] sm:$0xff]  ;;  %v121_v35 = vld [vmem:[#allocation2 + $0x80] sm:$0xff] }
  0x14   :  { %152 = vmatpush1.msra.mxu0 %v133_v7  ;;  %270 = vmatpush1.msra.mxu1 %v133_v7  ;;  %v120_v36 = vld [vmem:[#allocation2 + $0x78] sm:$0xff]  ;;  %v119_v37 = vld [vmem:[#allocation2 + $0x70] sm:$0xff]  ;;  %v118_v38 = vld [vmem:[#allocation2 + $0x68] sm:$0xff] }
  0x15   :  { %153 = vmatprep.subr.mxu0 %v132_v8  ;;  %255 = vmatprep.subr.mxu1 %v132_v8  ;;  %v117_v39 = vld [vmem:[#allocation2 + $0x60] sm:$0xff]  ;;  %v116_v40 = vld [vmem:[#allocation2 + $0x58] sm:$0xff]  ;;  %v115_v41 = vld [vmem:[#allocation2 + $0x50] sm:$0xff] }
  0x16   :  { %154 = vmatpush1.msra.mxu0 %v131_v9  ;;  %271 = vmatpush1.msra.mxu1 %v131_v9  ;;  %v114_v42 = vld [vmem:[#allocation2 + $0x48] sm:$0xff]  ;;  %v113_v43 = vld [vmem:[#allocation2 + $0x40] sm:$0xff]  ;;  %v112_v44 = vld [vmem:[#allocation2 + $0x38] sm:$0xff] }
  0x17   :  { %155 = vmatprep.subr.mxu0 %v130_v10  ;;  %256 = vmatprep.subr.mxu1 %v130_v10  ;;  %v111_v45 = vld [vmem:[#allocation2 + $0x30] sm:$0xff]  ;;  %v110_v46 = vld [vmem:[#allocation2 + $0x28] sm:$0xff]  ;;  %v109_v47 = vld [vmem:[#allocation2 + $0x20] sm:$0xff] }
  0x18   :  { %156 = vmatpush1.msra.mxu0 %v129_v11  ;;  %272 = vmatpush1.msra.mxu1 %v129_v11  ;;  %v108_v48 = vld [vmem:[#allocation2 + $0x18] sm:$0xff]  ;;  %v107_v49 = vld [vmem:[#allocation2 + $0x10] sm:$0xff]  ;;  %v106_v50 = vld [vmem:[#allocation2 + $0x8] sm:$0xff] }
  0x19   :  { %157 = vmatprep.subr.mxu0 %v128_v28  ;;  %257 = vmatprep.subr.mxu1 %v128_v28  ;;  %v105_v51 = vld [vmem:[#allocation2] sm:$0xff] }
  0x1a   :  { %158 = vmatpush1.msra.mxu0 %v127_v29  ;;  %273 = vmatpush1.msra.mxu1 %v127_v29  ;;  %v252_v4 = vld [vmem:[%s423_s2] ss:$0 sm:$0xff] }
  0x1b   :  { %159 = vmatprep.subr.mxu0 %v126_v30  ;;  %258 = vmatprep.subr.mxu1 %v126_v30 }
  0x1c   :  { %160 = vmatpush1.msra.mxu0 %v125_v31  ;;  %274 = vmatpush1.msra.mxu1 %v125_v31 }
  0x1d   :  { %161 = vmatprep.subr.mxu0 %v124_v32  ;;  %259 = vmatprep.subr.mxu1 %v124_v32 }
  0x1e   :  { %162 = vmatpush1.msra.mxu0 %v123_v33  ;;  %275 = vmatpush1.msra.mxu1 %v123_v33 }
  0x1f   :  { %163 = vmatprep.subr.mxu0 %v122_v34  ;;  %260 = vmatprep.subr.mxu1 %v122_v34 }
  0x20   :  { %164 = vmatpush1.msra.mxu0 %v121_v35  ;;  %276 = vmatpush1.msra.mxu1 %v121_v35 }
  0x21   :  { %165 = vmatprep.subr.mxu0 %v120_v36  ;;  %261 = vmatprep.subr.mxu1 %v120_v36 }
  0x22   :  { %166 = vmatpush1.msra.mxu0 %v119_v37  ;;  %277 = vmatpush1.msra.mxu1 %v119_v37 }
  0x23   :  { %167 = vmatprep.subr.mxu0 %v118_v38  ;;  %262 = vmatprep.subr.mxu1 %v118_v38 }
  0x24   :  { %168 = vmatpush1.msra.mxu0 %v117_v39  ;;  %278 = vmatpush1.msra.mxu1 %v117_v39 }
  0x25   :  { %169 = vmatprep.subr.mxu0 %v116_v40  ;;  %263 = vmatprep.subr.mxu1 %v116_v40 }
  0x26   :  { %170 = vmatpush1.msra.mxu0 %v115_v41  ;;  %279 = vmatpush1.msra.mxu1 %v115_v41 }
  0x27   :  { %171 = vmatprep.subr.mxu0 %v114_v42  ;;  %264 = vmatprep.subr.mxu1 %v114_v42 }
  0x28   :  { %172 = vmatpush1.msra.mxu0 %v113_v43  ;;  %280 = vmatpush1.msra.mxu1 %v113_v43 }
  0x29   :  { %173 = vmatprep.subr.mxu0 %v112_v44  ;;  %265 = vmatprep.subr.mxu1 %v112_v44 }
  0x2a   :  { %174 = vmatpush1.msra.mxu0 %v111_v45  ;;  %281 = vmatpush1.msra.mxu1 %v111_v45 }
  0x2b   :  { %175 = vmatprep.subr.mxu0 %v110_v46  ;;  %266 = vmatprep.subr.mxu1 %v110_v46 }
  0x2c   :  { %176 = vmatpush1.msra.mxu0 %v109_v47  ;;  %282 = vmatpush1.msra.mxu1 %v109_v47 }
  0x2d   :  { %177 = vmatprep.subr.mxu0 %v108_v48  ;;  %267 = vmatprep.subr.mxu1 %v108_v48 }
  0x2e   :  { %178 = vmatpush1.msra.mxu0 %v107_v49  ;;  %283 = vmatpush1.msra.mxu1 %v107_v49 }
  0x2f   :  { %179 = vmatprep.subr.mxu0 %v106_v50  ;;  %268 = vmatprep.subr.mxu1 %v106_v50 }
  0x30   :  { %180 = vmatpush1.msra.mxu0 %v105_v51  ;;  %284 = vmatpush1.msra.mxu1 %v105_v51 }
  0x97   :  { %v39_v12 = vpop.xlane.xlu0 %38  ;;  %v41_v13 = vpop.xlane.xlu1 %40 }
  0x98   :  { %v47_v14 = vmul.f32 0.0078125, %v39_v12  ;;  %v48_v15 = vmul.f32 0.0078125, %v41_v13 }
  0x9a   :  { %v368_v16 = vsub.f32 %v34_v0, %v47_v14  ;;  %v370_v17 = vsub.f32 %v35_v1, %v48_v15 }
  0x9b   :  { %v43_v18 = vpop.xlane.xlu0 %42  ;;  %v45_v19 = vpop.xlane.xlu1 %44 }
  0x9c   :  { %v49_v20 = vmul.f32 0.0078125, %v43_v18  ;;  %v55_v21 = vmul.f32 %v368_v16, %v368_v16  ;;  %v50_v22 = vmul.f32 0.0078125, %v45_v19  ;;  %v56_v25 = vmul.f32 %v370_v17, %v370_v17 }
  0x9e   :  { %v374_v23 = vsub.f32 %v36_v2, %v49_v20  ;;  %59 = vadd.xlane.f32.xlu0 %v55_v21  ;;  %v376_v24 = vsub.f32 %v37_v3, %v50_v22  ;;  %v251_v2 = vld [vmem:[%s422_s1] ss:$0 sm:$0xff]  ;;  %v139_v20 = vlaneseq }
  0xa0   :  { %v57_v26 = vmul.f32 %v374_v23, %v374_v23  ;;  %v58_v27 = vmul.f32 %v376_v24, %v376_v24  ;;  %v140_v21 = vshrl.u32 %v139_v20, 7 }
  0xa2   :  { %61 = vadd.xlane.f32.xlu0 %v56_v25  ;;  %63 = vadd.xlane.f32.xlu1 %v57_v26  ;;  %v141_v22 = vsub.s32 0, %v140_v21 }
  0xa6   :  { %65 = vadd.xlane.f32.xlu1 %v58_v27 }
 0x127   :  { %v60_v53 = vpop.xlane.xlu0 %59 }
 0x128   :  { %v67_v54 = vmul.f32 0.0078125, %v60_v53 }
 0x12a   :  { %v71_v55 = vadd.f32 1e-05, %v67_v54 }
 0x12b   :  { %v64_v56 = vpop.xlane.xlu1 %63  ;;  %v62_v57 = vpop.xlane.xlu0 %61 }
 0x12c   :  { %289 = vrsqrt.f32 %v71_v55  ;;  %v69_v58 = vmul.f32 0.0078125, %v64_v56  ;;  %v68_v59 = vmul.f32 0.0078125, %v62_v57 }
 0x12e   :  { %v73_v60 = vadd.f32 1e-05, %v69_v58  ;;  %v72_v61 = vadd.f32 1e-05, %v68_v59 }
 0x12f   :  { %v66_v62 = vpop.xlane.xlu1 %65 }
 0x130   :  { %291 = vrsqrt.f32 %v73_v60  ;;  %v70_v63 = vmul.f32 0.0078125, %v66_v62 }
 0x131   :  { %293 = vrsqrt.f32 %v72_v61 }
 0x132   :  { %v74_v0 = vadd.f32 1e-05, %v70_v63 }
 0x134   :  { %295 = vrsqrt.f32 %v74_v0 }
 0x139   :  { %v290_v1 = vpop.eup %289 }
 0x13a   :  { %v79_v3 = vmul.f32 %v290_v1, %v368_v16 }
 0x13c   :  { %v90_v5 = vmul.f32 %v251_v2, %v79_v3 }
 0x13d   :  { %v292_v6 = vpop.eup %291 }
 0x13e   :  { %v294_v7 = vpop.eup %293  ;;  %v101_v8 = vadd.f32 %v252_v4, %v90_v5  ;;  %v81_v9 = vmul.f32 %v292_v6, %v374_v23  ;;  %v145_v23 = vsub.s32 1, %v140_v21 }
 0x13f   :  { %v80_v10 = vmul.f32 %v294_v7, %v370_v17  ;;  %v137_v17 = vld [vmem:[%s425_s4] sm:$0x3] }
 0x140   :  { %214 = vmatmul.mubr.f32.vlgmr.msra.gmra.mxu0 %v101_v8  ;;  %v92_v11 = vmul.f32 %v251_v2, %v81_v9  ;;  %v142_v25 = vrot.slane %v137_v17, %v141_v22  ;;  %v146_v26 = vrot.slane %v137_v17, %v145_v23 }
 0x141   :  { %v296_v12 = vpop.eup %295  ;;  %219 = vmatprep.mubr.f32.mxu0 %v322_v52  ;;  %v91_v13 = vmul.f32 %v251_v2, %v80_v10 }
 0x142   :  { %v103_v14 = vadd.f32 %v252_v4, %v92_v11  ;;  %v82_v15 = vmul.f32 %v296_v12, %v376_v24 }
 0x143   :  { %v102_v16 = vadd.f32 %v252_v4, %v91_v13 }
 0x144   :  { %226 = vmatmul.mubr.f32.vlgmr.msra.gmra.mxu1 %v103_v14  ;;  %v93_v18 = vmul.f32 %v251_v2, %v82_v15 }
 0x145   :  { %220 = vmatmul.mubr.f32.gmra.mxu0 %v102_v16  ;;  %231 = vmatprep.mubr.f32.mxu1 %v322_v52 }
 0x146   :  { %v104_v19 = vadd.f32 %v252_v4, %v93_v18 }
 0x148   :  { %232 = vmatmul.mubr.f32.gmra.mxu1 %v104_v19 }
 0x200   :  { %v215_v27 = vpop.f32.mrf.mxu0 }
 0x201   :  { %v216_v28 = vadd.f32 %v215_v27, %v142_v25 }
 0x202   :  { %v217_v24 = vpop.f32.mrf.mxu0 }
 0x203   :  { %238 = vst [vmem:[%s426_s5] sm:$0xff] %v216_v28  ;;  %v218_v29 = vadd.f32 %v217_v24, %v146_v26 }
 0x204   :  { %v227_v30 = vpop.f32.mrf.mxu1 }
 0x205   :  { %239 = vst [vmem:[%s426_s5 + $0x8] sm:$0xff] %v218_v29  ;;  %v221_v31 = vpop.f32.mrf.mxu0  ;;  %v228_v32 = vadd.f32 %v227_v30, %v142_v25 }
 0x206   :  { %v222_v33 = vadd.f32 %v221_v31, %v142_v25  ;;  %v229_v34 = vpop.f32.mrf.mxu1 }
 0x207   :  { %242 = vst [vmem:[%s426_s5 + $0x20] sm:$0xff] %v228_v32  ;;  %v223_v35 = vpop.f32.mrf.mxu0  ;;  %v230_v36 = vadd.f32 %v229_v34, %v146_v26 }
 0x208   :  { %240 = vst [vmem:[%s426_s5 + $0x10] sm:$0xff] %v222_v33  ;;  %v224_v37 = vadd.f32 %v223_v35, %v146_v26  ;;  %v233_v38 = vpop.f32.mrf.mxu1 }
 0x209   :  { %243 = vst [vmem:[%s426_s5 + $0x28] sm:$0xff] %v230_v36  ;;  %v234_v39 = vadd.f32 %v233_v38, %v142_v25 }
 0x20a   :  { %241 = vst [vmem:[%s426_s5 + $0x18] sm:$0xff] %v224_v37  ;;  %v235_v40 = vpop.f32.mrf.mxu1 }
 0x20b   :  { %244 = vst [vmem:[%s426_s5 + $0x30] sm:$0xff] %v234_v39  ;;  %v236_v41 = vadd.f32 %v235_v40, %v146_v26 }
 0x20d   :  { %245 = vst [vmem:[%s426_s5 + $0x38] sm:$0xff] %v236_v41 }
 0x20e   :  { %250 = vsyncpa [#allocation3], 1 }

</bundles_post_ra>
